<compile_context>
chip_gen: v7x
topology: tpu7x:2x2x1
jax: 0.10.0
libtpu: 0.0.40
codegen_flags: <defaults>
</compile_context>

<pallas_src>
import functools

import jax
import jax.numpy as jnp
from jax.experimental import pallas as pl
from jax.experimental.pallas import tpu as pltpu


def _lane_roll(v, shift):
    """Cyclic shift along the last (lane) axis by a static amount (== jnp.roll)."""
    size = v.shape[-1]
    shift = shift % size
    if shift == 0:
        return v
    # result[..., i] = v[..., (i - shift) % size]
    return jnp.concatenate([v[..., size - shift:], v[..., :size - shift]], axis=-1)


def _sum_over_h(v, H, W):
    """Residue-class sum over the H-groups of a flattened (H*W) lane axis.

    Lane index l = h*W + w.  Returns s with s[..., h*W + w] = sum_{h'} v[..., h'*W + w],
    i.e. the sum over H already broadcast back over H.  Uses O(log2 H) static cyclic
    lane rotations via binary doubling (works for any H, power of two or not).
    """
    total = None
    terms_in_total = 0
    part, terms_in_part = v, 1        # `part` = sum of `terms_in_part` shifted copies
    rem = H
    while rem:
        if rem & 1:
            if total is None:
                total, terms_in_total = part, terms_in_part
            else:
                total = total + _lane_roll(part, terms_in_total * W)
                terms_in_total += terms_in_part
        rem >>= 1
        if rem:
            part = part + _lane_roll(part, terms_in_part * W)
            terms_in_part *= 2
    return total


def _grn_kernel(H, W, x_ref, gb_ref, o_ref):
    """GRN for one batch block.  x_ref/o_ref: (BN, C, H*W) f32; gb_ref: SMEM (2,) f32."""
    HW = H * W
    x = x_ref[...]                                    # (BN, C, HW), lane-dense
    sq = x * x
    acc = _sum_over_h(sq, H, W)                       # sum_h x^2, pre-broadcast over h
    gx = jnp.sqrt(acc)                                # gx[., c, h*W + w] = ||x[., c, :, w]||

    # mean over W: every distinct gx[., c, w] appears exactly H times along the lane
    # axis, so a full-lane sum equals H * sum_w gx  ->  divide by H*W.
    denom = jnp.sum(gx, axis=-1, keepdims=True) * (1.0 / HW) + 1e-8   # (BN, C, 1)
    nx = gx * (1.0 / denom)                                            # (BN, C, HW)

    gamma = gb_ref[0]
    beta = gb_ref[1]
    o_ref[...] = gamma * (x * nx) + beta + x


def _pick_batch_block(N, bytes_per_image, target_bytes=2 * 1024 * 1024):
    """Largest divisor of N whose block stays around `target_bytes`."""
    bn = max(1, min(N, target_bytes // max(bytes_per_image, 1)))
    while N % bn:
        bn -= 1
    return bn


def grn_forward(x_nchw, gamma, beta):
    """GRN forward.  x_nchw: (N, C, H, W) (PyTorch NCHW layout)."""
    N, C, H, W = x_nchw.shape
    HW = H * W

    # Free reshape (contiguous minor-dim merge): (N, C, H, W) -> (N, C, H*W).
    x2 = x_nchw.reshape(N, C, HW).astype(jnp.float32)
    gb = jnp.stack([jnp.asarray(gamma, jnp.float32).reshape(()),
                    jnp.asarray(beta, jnp.float32).reshape(())])

    bn = _pick_batch_block(N, C * HW * 4)
    kernel = functools.partial(_grn_kernel, H, W)
    out = pl.pallas_call(
        kernel,
        out_shape=jax.ShapeDtypeStruct((N, C, HW), jnp.float32),
        grid=(N // bn,),
        in_specs=[
            pl.BlockSpec((bn, C, HW), lambda n: (n, 0, 0)),
            pl.BlockSpec(memory_space=pltpu.MemorySpace.SMEM),   # [gamma, beta]
        ],
        out_specs=pl.BlockSpec((bn, C, HW), lambda n: (n, 0, 0)),
        compiler_params=pltpu.CompilerParams(
            dimension_semantics=("parallel",)),
    )(x2, gb)
    return out.reshape(N, C, H, W)


# Pure-JAX reference mirroring the PyTorch forward (for validation).
def grn_ref(x, gamma, beta):
    gx = jnp.sqrt(jnp.sum(x * x, axis=2, keepdims=True))
    nx = gx / (jnp.mean(gx, axis=-1, keepdims=True) + 1e-8)
    g = jnp.asarray(gamma, jnp.float32).reshape(())
    b = jnp.asarray(beta, jnp.float32).reshape(())
    return g * (x * nx) + b + x


if __name__ == "__main__":
    key = jax.random.PRNGKey(0)
    # GRN is applied to an NCHW activation; small deterministic test shapes.
    N, C, H, W = 2, 4, 16, 16
    x = jax.random.normal(key, (N, C, H, W), jnp.float32)

    # torch initializes gamma/beta to zeros (GRN == identity); use nonzero values
    # first so the full normalization path is exercised.
    gamma = jnp.full((1,), 0.3, jnp.float32)
    beta = jnp.full((1,), -0.1, jnp.float32)

    out = jax.block_until_ready(grn_forward(x, gamma, beta))
    ref = grn_ref(x, gamma, beta)
    max_err = float(jnp.max(jnp.abs(out - ref)))
    assert jnp.allclose(out, ref, rtol=1e-4, atol=1e-5), max_err

    # torch-default parameters (gamma = beta = 0) -> GRN is the identity.
    zero = jnp.zeros((1,), jnp.float32)
    out0 = jax.block_until_ready(grn_forward(x, zero, zero))
    assert jnp.allclose(out0, x, rtol=1e-5, atol=1e-6), "identity check failed"

    print("KERNEL_OK")
</pallas_src>

<mosaic_0001>
module attributes {stable_mosaic.version = 11 : i64} {
  func.func @_grn_kernel(%arg0: i32, %arg1: memref<2x4x256xf32, #tpu.memory_space<vmem>>, %arg2: memref<2xf32, #tpu.memory_space<smem>>, %arg3: memref<2x4x256xf32, #tpu.memory_space<vmem>>) attributes {dimension_semantics = [#tpu.dimension_semantics<parallel>], iteration_bounds = array<i64: 1>, scalar_prefetch = 0 : i64, scratch_operands = 0 : i64, tpu.core_type = #tpu.core_type<tc>, window_params = [{transform_indices = @transform_0, window_bounds = array<i64: 2, 4, 256>}, {transform_indices = @transform_1, window_bounds = array<i64: 2>}, {transform_indices = @transform_2, window_bounds = array<i64: 2, 4, 256>}]} {
    %c0 = arith.constant 0 : index
    %c0_0 = arith.constant 0 : index
    %c0_1 = arith.constant 0 : index
    %0 = vector.load %arg1[%c0, %c0_0, %c0_1] : memref<2x4x256xf32, #tpu.memory_space<vmem>>, vector<2x4x256xf32>
    %1 = arith.mulf %0, %0 : vector<2x4x256xf32>
    %2 = vector.extract_strided_slice %1 {offsets = [0, 0, 240], sizes = [2, 4, 16], strides = [1, 1, 1]} : vector<2x4x256xf32> to vector<2x4x16xf32>
    %3 = vector.extract_strided_slice %1 {offsets = [0, 0, 0], sizes = [2, 4, 240], strides = [1, 1, 1]} : vector<2x4x256xf32> to vector<2x4x240xf32>
    %4 = tpu.concatenate %2, %3 in 2 : vector<2x4x16xf32>, vector<2x4x240xf32> -> vector<2x4x256xf32>
    %5 = arith.addf %1, %4 : vector<2x4x256xf32>
    %6 = vector.extract_strided_slice %5 {offsets = [0, 0, 224], sizes = [2, 4, 32], strides = [1, 1, 1]} : vector<2x4x256xf32> to vector<2x4x32xf32>
    %7 = vector.extract_strided_slice %5 {offsets = [0, 0, 0], sizes = [2, 4, 224], strides = [1, 1, 1]} : vector<2x4x256xf32> to vector<2x4x224xf32>
    %8 = tpu.concatenate %6, %7 in 2 : vector<2x4x32xf32>, vector<2x4x224xf32> -> vector<2x4x256xf32>
    %9 = arith.addf %5, %8 : vector<2x4x256xf32>
    %10 = vector.extract_strided_slice %9 {offsets = [0, 0, 192], sizes = [2, 4, 64], strides = [1, 1, 1]} : vector<2x4x256xf32> to vector<2x4x64xf32>
    %11 = vector.extract_strided_slice %9 {offsets = [0, 0, 0], sizes = [2, 4, 192], strides = [1, 1, 1]} : vector<2x4x256xf32> to vector<2x4x192xf32>
    %12 = tpu.concatenate %10, %11 in 2 : vector<2x4x64xf32>, vector<2x4x192xf32> -> vector<2x4x256xf32>
    %13 = arith.addf %9, %12 : vector<2x4x256xf32>
    %14 = vector.extract_strided_slice %13 {offsets = [0, 0, 128], sizes = [2, 4, 128], strides = [1, 1, 1]} : vector<2x4x256xf32> to vector<2x4x128xf32>
    %15 = vector.extract_strided_slice %13 {offsets = [0, 0, 0], sizes = [2, 4, 128], strides = [1, 1, 1]} : vector<2x4x256xf32> to vector<2x4x128xf32>
    %16 = tpu.concatenate %14, %15 in 2 : vector<2x4x128xf32>, vector<2x4x128xf32> -> vector<2x4x256xf32>
    %17 = arith.addf %13, %16 : vector<2x4x256xf32>
    %18 = math.sqrt %17 : vector<2x4x256xf32>
    %cst = arith.constant dense<0.000000e+00> : vector<2x4xf32>
    %19 = vector.multi_reduction <add>, %18, %cst [2] : vector<2x4x256xf32> to vector<2x4xf32>
    %20 = vector.shape_cast %19 : vector<2x4xf32> to vector<2x4x1xf32>
    %cst_2 = arith.constant 3.906250e-03 : f32
    %21 = vector.broadcast %cst_2 : f32 to vector<2x4x1xf32>
    %22 = arith.mulf %20, %21 : vector<2x4x1xf32>
    %cst_3 = arith.constant 9.99999993E-9 : f32
    %23 = vector.broadcast %cst_3 : f32 to vector<2x4x1xf32>
    %24 = arith.addf %22, %23 : vector<2x4x1xf32>
    %cst_4 = arith.constant 1.000000e+00 : f32
    %25 = vector.broadcast %cst_4 : f32 to vector<2x4x1xf32>
    %26 = arith.divf %25, %24 : vector<2x4x1xf32>
    %27 = vector.broadcast %26 : vector<2x4x1xf32> to vector<2x4x256xf32>
    %28 = arith.mulf %18, %27 : vector<2x4x256xf32>
    %c0_5 = arith.constant 0 : index
    %29 = memref.load %arg2[%c0_5] : memref<2xf32, #tpu.memory_space<smem>>
    %c1 = arith.constant 1 : index
    %30 = memref.load %arg2[%c1] : memref<2xf32, #tpu.memory_space<smem>>
    %31 = arith.mulf %0, %28 : vector<2x4x256xf32>
    %32 = vector.broadcast %29 : f32 to vector<2x4x256xf32>
    %33 = arith.mulf %32, %31 : vector<2x4x256xf32>
    %34 = vector.broadcast %30 : f32 to vector<2x4x256xf32>
    %35 = arith.addf %33, %34 : vector<2x4x256xf32>
    %36 = arith.addf %35, %0 : vector<2x4x256xf32>
    %c0_6 = arith.constant 0 : index
    %c0_7 = arith.constant 0 : index
    %c0_8 = arith.constant 0 : index
    %37 = vector.load %arg3[%c0_6, %c0_7, %c0_8] : memref<2x4x256xf32, #tpu.memory_space<vmem>>, vector<2x4x256xf32>
    tpu.vector_store %arg3[%c0_6, %c0_7, %c0_8], %36 {strides = array<i32>} : memref<2x4x256xf32, #tpu.memory_space<vmem>>, vector<2x4x256xf32>,
    return
  }
  func.func @transform_0(%arg0: i32) -> (i32, i32, i32) {
    %c0_i32 = arith.constant 0 : i32
    %c0_i32_0 = arith.constant 0 : i32
    %c0_i32_1 = arith.constant 0 : i32
    return %arg0, %c0_i32, %c0_i32_0 : i32, i32, i32
  }
  func.func @transform_1(%arg0: i32) -> i32 {
    %c0_i32 = arith.constant 0 : i32
    %c0_i32_0 = arith.constant 0 : i32
    return %c0_i32 : i32
  }
  func.func @transform_2(%arg0: i32) -> (i32, i32, i32) {
    %c0_i32 = arith.constant 0 : i32
    %c0_i32_0 = arith.constant 0 : i32
    %c0_i32_1 = arith.constant 0 : i32
    return %arg0, %c0_i32, %c0_i32_0 : i32, i32, i32
  }
}

</mosaic_0001>

<bundles_post_ra>
// kernel: tpu_custom_call.1
= control target key start
LH: loop header
LB: loop body
LE: loop exit
PB: predicated region body
PF: predicated region fallthrough
CT: control target
= control target key end

     0   :  { %7 = vsyncpa [#allocation3], 0  ;;  %s380_s0 = inlined_call_operand.hbm [shape: f32[2,4,256], index: 0, kind: input, shape index: {}]   ;;  %s381_s1 = inlined_call_operand.vmem [shape: f32[2], index: 1, kind: input, shape index: {}]   ;;  %s382_s2 = inlined_call_operand.hbm [shape: f32[2,4,256], index: 2, kind: output, shape index: {}]  }
   0x1   :  { %8 = vsyncpa [#allocation5], 0 }
   0x2   :  { %9 = vsyncpa [#allocation4], 0  ;;  %s311_s9 = smov [#allocation2]   ;;  %s28_s13 = sshll.u32 %s381_s1, 4  ;;  %s29_s13 = int_to_ptr.vmem [resolvable:$true] %s28_s13 }
   0x3   :  { %s15_s10 = sshll.u32 %s311_s9, 4  ;;  %s249_s16 = scalar_lea.hbm %s380_s0, 256  ;;  %s16_s10 = int_to_ptr.vmem [resolvable:$true] %s15_s10 }
   0x4   :  { %p250_p0 = scmp.ne.s32.totalorder %s380_s0, %s249_s16  ;;  %p253_p1 = scmp.lt.u32.totalorder %s249_s16, %s380_s0 }
   0x6   :  { %p255_p2 = pnand %p253_p1, %p250_p0 }
   0x8   :  { %258 = shalt.err (!%p255_p2)
}
   0x9   :  { %s259_s21 = scalar_lea.vmem %s16_s10, 256  ;;  %p264_p4 = scmp.lt.s32.totalorder %s16_s10, %s16_s10 }
   0xa   :  { %p260_p3 = scmp.ne.s32.totalorder %s16_s10, %s259_s21  ;;  %p265_p5 = scmp.lt.s32.totalorder %s259_s21, %s259_s21 }
   0xc   :  { %p266_p6 = por %p265_p5, %p264_p4 }
   0xe   :  { %p267_p7 = pnand %p266_p6, %p260_p3 }
  0x10   :  { %270 = shalt.err (!%p267_p7)
}
  0x11   :  { %s312_s1 = smov 128   ;;  %s313_s22 = smov 8  }
  0x12   :  { %21 = dma.hbm_to_vmem [thread:$0]  %s380_s0, 256, %s16_s10, [#allocation3], %s312_s1, %s312_s1, %s313_s22  }
  0x13   :  { %s271_s25 = scalar_lea.vmem %s29_s13, 16  ;;  %p276_p9 = scmp.lt.s32.totalorder %s29_s13, %s29_s13 }
  0x14   :  { %p272_p8 = scmp.ne.s32.totalorder %s29_s13, %s271_s25  ;;  %p277_p10 = scmp.lt.s32.totalorder %s271_s25, %s271_s25 }
  0x16   :  { %p278_p11 = por %p277_p10, %p276_p9 }
  0x18   :  { %p279_p12 = pnand %p278_p11, %p272_p8 }
  0x1a   :  { %282 = shalt.err (!%p279_p12)
}
  0x1b   :  { %s314_s26 = smov [#allocation6]  }
  0x1c   :  { %31 = dma.vmem_to_smem %s29_s13, 16, %s314_s26, [#allocation5]  }
  0x1d   :  { %305 = dma.done.wait [#allocation3], 256  }
  0x1e   :  { %306 = vsyncadd [#allocation3], 4294967040 }
  0x1f   :  { %307 = dma.done.wait [#allocation5], 16  }
  0x20   :  { %308 = vsyncadd [#allocation5], 4294967280 }
  0x21   :  { %38 = sfence }
  0x22   :  { %v353_v0 = vld [vmem:[#allocation2] sm:$0xff]  ;;  %v355_v1 = vld [vmem:[#allocation2 + $0x8] sm:$0xff]  ;;  %s315_s0 = smov 16   ;;  %vm57_vm0 = vcmask 130048   ;;  %s316_s27 = smov 32   ;;  %vm86_vm1 = vcmask 261120  }
  0x23   :  { %v41_v2 = vmul.f32 %v353_v0, %v353_v0  ;;  %v42_v3 = vmul.f32 %v355_v1, %v355_v1  ;;  %s317_s28 = smov 64   ;;  %vm115_vm2 = vcmask 523264   ;;  %vm160_vm5 = vcmask 1043456   ;;  %s199_s29 = sld [smem:[#allocation6]] }
  0x24   :  { %s231_s30 = sld [smem:[#allocation6 + $0x1]]  ;;  %s319_s3 = smov [#allocation7]  }
  0x25   :  { %53 = vrot.lane.b32.xlu1 %v41_v2, %s315_s0  ;;  %v45_v4 = vcombine.high %v41_v2, %v41_v2  ;;  %v46_v5 = vcombine.high %v42_v3, %v42_v3  ;;  %s218_s4 = sshll.u32 %s319_s3, 4  ;;  %s219_s4 = int_to_ptr.vmem [resolvable:$true] %s218_s4 }
  0x26   :  { %s283_s5 = scalar_lea.vmem %s219_s4, 256  ;;  %p288_p0 = scmp.lt.s32.totalorder %s219_s4, %s219_s4 }
  0x27   :  { %47 = vrot.lane.b32.xlu0 %v45_v4, %s315_s0  ;;  %p284_p13 = scmp.ne.s32.totalorder %s219_s4, %s283_s5  ;;  %p289_p1 = scmp.lt.s32.totalorder %s283_s5, %s283_s5 }
  0x29   :  { %55 = vrot.lane.b32.xlu1 %v42_v3, %s315_s0  ;;  %p290_p2 = por %p289_p1, %p288_p0 }
  0x2b   :  { %49 = vrot.lane.b32.xlu0 %v46_v5, %s315_s0  ;;  %p291_p3 = pnand %p290_p2, %p284_p13 }
  0x97   :  { %v54_v6 = vpop.permute.xlu1 %53 }
  0x99   :  { %v48_v7 = vpop.permute.xlu0 %47 }
  0x9a   :  { %v58_v8 = vsel %vm57_vm0, %v54_v6, %v48_v7  ;;  %v62_v9 = vsel %vm57_vm0, %v48_v7, %v54_v6 }
  0x9b   :  { %v66_v10 = vcombine.low %v62_v9, %v58_v8  ;;  %v56_v11 = vpop.permute.xlu1 %55 }
  0x9d   :  { %v70_v12 = vadd.f32 %v66_v10, %v41_v2  ;;  %v50_v13 = vpop.permute.xlu0 %49 }
  0x9e   :  { %v59_v14 = vsel %vm57_vm0, %v56_v11, %v50_v13  ;;  %v63_v15 = vsel %vm57_vm0, %v50_v13, %v56_v11  ;;  %v318_v11 = vmov 839922192   ;;  %v184_v13 = vlaneseq }
  0x9f   :  { %v67_v16 = vcombine.low %v63_v15, %v59_v14  ;;  %v74_v17 = vcombine.high %v70_v12, %v70_v12 }
  0xa1   :  { %v71_v18 = vadd.f32 %v67_v16, %v42_v3  ;;  %76 = vrot.lane.b32.xlu0 %v74_v17, %s316_s27 }
  0xa3   :  { %v75_v19 = vcombine.high %v71_v18, %v71_v18 }
  0xa5   :  { %82 = vrot.lane.b32.xlu0 %v70_v12, %s316_s27  ;;  %78 = vrot.lane.b32.xlu1 %v75_v19, %s316_s27 }
  0xa9   :  { %84 = vrot.lane.b32.xlu1 %v71_v18, %s316_s27 }
 0x113   :  { %v77_v20 = vpop.permute.xlu0 %76 }
 0x117   :  { %v79_v21 = vpop.permute.xlu1 %78  ;;  %v83_v22 = vpop.permute.xlu0 %82 }
 0x118   :  { %v87_v23 = vsel %vm86_vm1, %v83_v22, %v77_v20  ;;  %v91_v24 = vsel %vm86_vm1, %v77_v20, %v83_v22 }
 0x119   :  { %v95_v25 = vcombine.low %v91_v24, %v87_v23  ;;  %v203_v24 = vstv %s199_s29 }
 0x11b   :  { %v99_v26 = vadd.f32 %v95_v25, %v70_v12  ;;  %v85_v27 = vpop.permute.xlu1 %84  ;;  %v182_v12 = vunpack.c.l.s4 %v318_v11 }
 0x11c   :  { %v88_v28 = vsel %vm86_vm1, %v85_v27, %v79_v21  ;;  %v92_v29 = vsel %vm86_vm1, %v79_v21, %v85_v27  ;;  %v206_v27 = vstv %s231_s30 }
 0x11d   :  { %v96_v30 = vcombine.low %v92_v29, %v88_v28  ;;  %v103_v31 = vcombine.high %v99_v26, %v99_v26  ;;  %v183_v17 = vunpack.c.0.s8 %v182_v12 }
 0x11f   :  { %v100_v32 = vadd.f32 %v96_v30, %v71_v18  ;;  %105 = vrot.lane.b32.xlu0 %v103_v31, %s317_s28  ;;  %v185_v18 = vshrl.u32 %v184_v13, 7 }
 0x121   :  { %v104_v33 = vcombine.high %v100_v32, %v100_v32  ;;  %v186_v19 = vsub.s32 %v183_v17, %v185_v18 }
 0x123   :  { %107 = vrot.lane.b32.xlu1 %v104_v33, %s317_s28  ;;  %111 = vrot.lane.b32.xlu0 %v99_v26, %s317_s28 }
 0x127   :  { %113 = vrot.lane.b32.xlu1 %v100_v32, %s317_s28 }
 0x191   :  { %v106_v34 = vpop.permute.xlu0 %105 }
 0x195   :  { %v108_v35 = vpop.permute.xlu1 %107  ;;  %v112_v36 = vpop.permute.xlu0 %111 }
 0x196   :  { %v116_v37 = vsel %vm115_vm2, %v112_v36, %v106_v34  ;;  %v120_v38 = vsel %vm115_vm2, %v106_v34, %v112_v36 }
 0x197   :  { %v124_v39 = vcombine.low %v120_v38, %v116_v37 }
 0x199   :  { %v128_v40 = vadd.f32 %v124_v39, %v99_v26  ;;  %v114_v41 = vpop.permute.xlu1 %113 }
 0x19a   :  { %v117_v42 = vsel %vm115_vm2, %v114_v41, %v108_v35  ;;  %v121_v43 = vsel %vm115_vm2, %v108_v35, %v114_v41 }
 0x19b   :  { %v132_v44 = vcombine.high %v128_v40, %v128_v40  ;;  %v125_v45 = vcombine.low %v121_v43, %v117_v42 }
 0x19d   :  { %v134_v46 = vcombine.low %v132_v44, %v128_v40  ;;  %v129_v47 = vadd.f32 %v125_v45, %v100_v32 }
 0x19f   :  { %v138_v48 = vadd.f32 %v134_v46, %v128_v40  ;;  %v133_v49 = vcombine.high %v129_v47, %v129_v47 }
 0x1a1   :  { %v135_v50 = vcombine.low %v133_v49, %v129_v47  ;;  %241 = vrsqrt.f32 %v138_v48  ;;  %vm142_vm3 = vcmp.eq.f32.partialorder %v138_v48, inf  ;;  %v145_v54 = vand.u32 2147483648, %v138_v48 }
 0x1a2   :  { %vm144_vm4 = vcmp.eq.f32.partialorder %v138_v48, 0.0 }
 0x1a3   :  { %v139_v51 = vadd.f32 %v135_v50, %v129_v47 }
 0x1a5   :  { %243 = vrsqrt.f32 %v139_v51  ;;  %vm149_vm6 = vcmp.eq.f32.partialorder %v139_v51, inf  ;;  %v152_v60 = vand.u32 2147483648, %v139_v51  ;;  %vm151_vm7 = vcmp.eq.f32.partialorder %v139_v51, 0.0 }
 0x1ab   :  { %v242_v52 = vpop.eup %241 }
 0x1ac   :  { %v141_v53 = vmul.f32 %v242_v52, %v138_v48 }
 0x1ae   :  { %v143_v55 = vsel %vm142_vm3, %v138_v48, %v141_v53 }
 0x1af   :  { %v244_v56 = vpop.eup %243  ;;  %v146_v57 = vsel %vm144_vm4, %v145_v54, %v143_v55 }
 0x1b0   :  { %v156_v58 = vcombine.high %v146_v57, %v146_v57  ;;  %v148_v59 = vmul.f32 %v244_v56, %v139_v51  ;;  %v161_v61 = vsel %vm160_vm5, %v146_v57, 0.0 }
 0x1b2   :  { %v162_v62 = vsel %vm160_vm5, %v156_v58, 0.0  ;;  %v150_v63 = vsel %vm149_vm6, %v139_v51, %v148_v59 }
 0x1b3   :  { %v163_v2 = vadd.f32 %v162_v62, %v161_v61  ;;  %v153_v3 = vsel %vm151_vm7, %v152_v60, %v150_v63 }
 0x1b4   :  { %v157_v4 = vcombine.high %v153_v3, %v153_v3  ;;  %v166_v5 = vsel %vm160_vm5, %v153_v3, 0.0 }
 0x1b5   :  { %164 = vadd.xlane.f32.xlu0 %v163_v2 }
 0x1b6   :  { %v167_v6 = vsel %vm160_vm5, %v157_v4, 0.0 }
 0x1b7   :  { %v168_v7 = vadd.f32 %v167_v6, %v166_v5 }
 0x1b9   :  { %169 = vadd.xlane.f32.xlu1 %v168_v7 }
 0x242   :  { %v165_v8 = vpop.xlane.xlu0 %164 }
 0x243   :  { %v171_v9 = vmul.f32 0.00390625, %v165_v8 }
 0x245   :  { %v173_v10 = vadd.f32 1e-08, %v171_v9 }
 0x246   :  { %v170_v14 = vpop.xlane.xlu1 %169 }
 0x247   :  { %245 = vrcp.f32 %v173_v10  ;;  %v172_v15 = vmul.f32 0.00390625, %v170_v14 }
 0x249   :  { %v174_v16 = vadd.f32 1e-08, %v172_v15 }
 0x24b   :  { %247 = vrcp.f32 %v174_v16 }
 0x251   :  { %v246_v20 = vpop.eup %245 }
 0x252   :  { %v187_v21 = vrot.slane %v246_v20, %v186_v19 }
 0x254   :  { %v197_v22 = vmul.f32 %v187_v21, %v146_v57 }
 0x255   :  { %v248_v23 = vpop.eup %247 }
 0x256   :  { %v194_v25 = vrot.slane %v248_v23, %v186_v19  ;;  %v201_v26 = vmul.f32 %v197_v22, %v353_v0 }
 0x258   :  { %v198_v28 = vmul.f32 %v194_v25, %v153_v3  ;;  %v204_v29 = vmul.f32 %v203_v24, %v201_v26 }
 0x25a   :  { %v202_v30 = vmul.f32 %v198_v28, %v355_v1  ;;  %v207_v31 = vadd.f32 %v206_v27, %v204_v29 }
 0x25c   :  { %v205_v32 = vmul.f32 %v203_v24, %v202_v30  ;;  %v209_v33 = vadd.f32 %v207_v31, %v353_v0 }
 0x25e   :  { %v208_v34 = vadd.f32 %v206_v27, %v205_v32  ;;  %211 = vst [vmem:[#allocation7] sm:$0xff] %v209_v33 }
 0x260   :  { %v210_v35 = vadd.f32 %v208_v34, %v355_v1 }
 0x262   :  { %212 = vst [vmem:[#allocation7 + $0x8] sm:$0xff] %v210_v35 }
 0x263   :  { %294 = shalt.err (!%p291_p3)
}
 0x264   :  { %s295_s8 = scalar_lea.hbm %s382_s2, 256 }
 0x265   :  { %p296_p4 = scmp.ne.s32.totalorder %s382_s2, %s295_s8  ;;  %p299_p5 = scmp.lt.u32.totalorder %s295_s8, %s382_s2 }
 0x267   :  { %p301_p6 = pnand %p299_p5, %p296_p4 }
 0x269   :  { %304 = shalt.err (!%p301_p6)
}
 0x26a   :  { %224 = dma.vmem_to_hbm [thread:$0]  %s219_s4, 256, %s382_s2, [#allocation4], %s312_s1, %s312_s1, %s313_s22  }
 0x26b   :  { %309 = dma.done.wait [#allocation4], 256  }
 0x26c   :  { %310 = vsyncadd [#allocation4], 4294967040 }
 0x26d   :  { %228 = vsyncpa [#allocation3], 1 }
 0x26e   :  { %229 = vsyncpa [#allocation4], 1 }
 0x26f   :  { %230 = vsyncpa [#allocation5], 1 }

</bundles_post_ra>
